<compile_context>
chip_gen: v7x
topology: tpu7x:2x2x1
jax: 0.10.0
libtpu: 0.0.40
codegen_flags: <defaults>
</compile_context>

<pallas_src>
import functools

import jax
import jax.numpy as jnp
from jax.experimental import pallas as pl
from jax.experimental.pallas import tpu as pltpu


def _round_up(n, m):
    return ((n + m - 1) // m) * m


def _vmem_capacity_bytes():
    """Physical VMEM per core; conservative fallback if the query fails."""
    try:
        info = pltpu.get_tpu_info()
        cap = getattr(info, "vmem_capacity_bytes", None)
        if cap:
            return int(cap)
    except Exception:
        pass
    return 64 * 1024 * 1024  # v7x-sized fallback (safe on every generation)


def _ffn_kernel(x_ref, w13_ref, w2t_ref, o_ref, *scratch):
    """One grid step: token tile i  x  hidden tile k.

    x_ref   : (tt, D)        token activations (resident across hidden axis)
    w13_ref : (D, 2*th)      fused [w1.T tile | w3.T tile] for hidden tile k
    w2t_ref : (th, D)        row tile of w2.T
    o_ref   : (tt, D)        output tile (constant block index over k => resident)
    scratch : optional (tt, D) f32 accumulator (only when output is not f32)
    """
    acc_ref = scratch[0] if scratch else o_ref
    k = pl.program_id(1)

    @pl.when(k == 0)
    def _init():
        acc_ref[...] = jnp.zeros_like(acc_ref)

    x = x_ref[...]
    th = w2t_ref.shape[0]

    # One fused MXU matmul for both gate projections, f32 accumulation.
    h = jnp.dot(x, w13_ref[...], preferred_element_type=jnp.float32)  # (tt, 2*th)
    h1 = h[:, :th]          # x @ w1.T tile   (static, lane-aligned slices)
    h3 = h[:, th:]          # x @ w3.T tile

    # SwiGLU gate in f32 (sigmoid goes to the EUP slot).
    gated = (h1 * jax.nn.sigmoid(h1)) * h3

    # Partial contraction over this hidden tile into the resident accumulator.
    # NOTE: gated is downcast to the weight dtype (e.g. bf16) before the MXU.
    acc_ref[...] += jnp.dot(gated.astype(w2t_ref.dtype), w2t_ref[...],
                            preferred_element_type=jnp.float32)

    if scratch:  # non-f32 output: cast once on the final hidden step
        @pl.when(k == pl.num_programs(1) - 1)
        def _finalize():
            o_ref[...] = acc_ref[...].astype(o_ref.dtype)


def prepare_ffn_weights(w1, w2, w3, *, tile_h=512):
    """One-time conversion from PyTorch layout to kernel layout.

    w1, w3: (H, D) ; w2: (D, H).  Pads H to a multiple of tile_h (exact no-op:
    SiLU(0)=0 and the matching w2.T rows are zero) and fuses w1.T / w3.T into
    one (D, 2*H_pad) array, block-interleaved per hidden tile so each grid
    step reads ONE contiguous (D, 2*tile_h) block.

    Returns (w13t, w2t, tile_h).  Pass the SAME tile_h to feed_forward.
    Do this at parameter-load time, NOT per forward call.
    """
    H, D = w1.shape
    assert w3.shape == (H, D) and w2.shape == (D, H)

    tile_h = max(128, (int(tile_h) // 128) * 128)
    tile_h = min(tile_h, _round_up(H, 128))
    H_pad = _round_up(H, tile_h)
    nk = H_pad // tile_h

    pad_h = H_pad - H
    w1p = jnp.pad(w1, ((0, pad_h), (0, 0))) if pad_h else w1
    w3p = jnp.pad(w3, ((0, pad_h), (0, 0))) if pad_h else w3
    w2p = jnp.pad(w2, ((0, 0), (0, pad_h))) if pad_h else w2

    w1t = w1p.T  # (D, H_pad)
    w3t = w3p.T  # (D, H_pad)
    # Block-interleave: hidden tile k occupies columns [2k*th, 2(k+1)*th) with
    # the first th columns from w1.T and the next th from w3.T.
    w13t = jnp.stack(
        [w1t.reshape(D, nk, tile_h), w3t.reshape(D, nk, tile_h)], axis=2
    ).reshape(D, 2 * H_pad)
    w2t = w2p.T  # (H_pad, D)
    return w13t, w2t, tile_h


@functools.partial(jax.jit, static_argnames=("tile_t", "tile_h", "weight_buffers"))
def feed_forward(x, w13t, w2t, *, tile_t=None, tile_h=512, weight_buffers=2):
    """LLaMA FeedForward. x: (B, S, D); w13t: (D, 2*H_pad); w2t: (H_pad, D).

    tile_h must match the value used in prepare_ffn_weights.
    """
    B, S, D = x.shape
    H_pad = w2t.shape[0]
    assert w13t.shape == (D, 2 * H_pad) and w2t.shape == (H_pad, D)
    assert H_pad % tile_h == 0, "tile_h must match prepare_ffn_weights"

    T = B * S
    x2d = x.reshape(T, D)

    x_bytes = jnp.dtype(x.dtype).itemsize
    w_bytes = jnp.dtype(w13t.dtype).itemsize
    out_is_f32 = x.dtype == jnp.float32
    out_bytes = x_bytes

    # ---- generation-aware tile_t / VMEM sizing -----------------------------
    cap = _vmem_capacity_bytes()
    budget = int(0.8 * cap)                      # headroom for compiler scratch

    if tile_t is None:
        # 128-MiB-VMEM chips (v5e/v6e): large token tiles to amortize weight
        # re-streaming; v7x (64 MiB): 512.
        tile_t = 1024 if cap >= 96 * 1024 * 1024 else 512
    tile_t = max(8, (int(tile_t) // 8) * 8)
    tile_t = min(tile_t, _round_up(T, 8))

    def vmem_need(tt):
        return (2 * tt * D * x_bytes                       # x tile, double-buffered
                + 2 * tt * D * out_bytes                   # output tile
                + weight_buffers * D * 2 * tile_h * w_bytes   # fused w1|w3 tile
                + weight_buffers * tile_h * D * w_bytes       # w2.T tile
                + (0 if out_is_f32 else tt * D * 4)        # f32 accumulator
                + 4 * tt * tile_h * 4)                     # f32 intermediates (h, gate, cast)

    while tile_t > 128 and vmem_need(tile_t) > budget:
        tile_t = max(128, (tile_t // 2 // 8) * 8)

    T_pad = _round_up(T, tile_t)
    if T_pad != T:  # zero rows give zero outputs; sliced off below
        x2d = jnp.pad(x2d, ((0, T_pad - T), (0, 0)))

    vmem_limit = int(min(budget, max(1.25 * vmem_need(tile_t), 32 * 1024 * 1024)))

    num_t_tiles = T_pad // tile_t
    grid = (num_t_tiles, H_pad // tile_h)

    scratch_shapes = [] if out_is_f32 else [pltpu.VMEM((tile_t, D), jnp.float32)]

    # Weights are re-read once per token tile -> reflect that in the estimate.
    cost = pl.CostEstimate(
        flops=6 * T_pad * D * H_pad,
        transcendentals=T_pad * H_pad,
        bytes_accessed=int(T_pad * D * x_bytes + T_pad * D * out_bytes
                           + 3 * H_pad * D * w_bytes * num_t_tiles),
    )

    # Optional deeper weight pipelining (only worth it on 128-MiB chips).
    w_kwargs = {}
    if weight_buffers and int(weight_buffers) > 2:
        w_kwargs = dict(pipeline_mode=pl.Buffered(int(weight_buffers)))

    out = pl.pallas_call(
        _ffn_kernel,
        out_shape=jax.ShapeDtypeStruct((T_pad, D), x.dtype),
        grid_spec=pltpu.PrefetchScalarGridSpec(
            num_scalar_prefetch=0,
            grid=grid,
            in_specs=[
                pl.BlockSpec((tile_t, D), lambda i, k: (i, 0)),               # x tokens
                pl.BlockSpec((D, 2 * tile_h), lambda i, k: (0, k), **w_kwargs),  # fused w1|w3
                pl.BlockSpec((tile_h, D), lambda i, k: (k, 0), **w_kwargs),   # w2.T rows
            ],
            out_specs=pl.BlockSpec((tile_t, D), lambda i, k: (i, 0)),
            scratch_shapes=scratch_shapes,
        ),
        compiler_params=pltpu.CompilerParams(
            dimension_semantics=("parallel", "arbitrary"),
            vmem_limit_bytes=vmem_limit,
        ),
        cost_estimate=cost,
    )(x2d, w13t, w2t)

    return out[:T].reshape(B, S, D)


def llama_hidden_dim(dim, multiple_of=256, ffn_dim_multiplier=None):
    hidden_dim = 4 * dim
    hidden_dim = int(2 * hidden_dim / 3)
    if ffn_dim_multiplier is not None:
        hidden_dim = int(ffn_dim_multiplier * hidden_dim)
    return multiple_of * ((hidden_dim + multiple_of - 1) // multiple_of)


def reference_feed_forward(x, w1, w2, w3):
    h1 = x @ w1.T
    swish = h1 * jax.nn.sigmoid(h1)
    return (swish * (x @ w3.T)) @ w2.T


if __name__ == "__main__":
    # ModelArgs-consistent small shapes: dim=128, multiple_of=256 -> hidden=512
    dim = 128
    hidden = llama_hidden_dim(dim, multiple_of=256)   # 512
    batch, seq = 2, 8

    key = jax.random.PRNGKey(0)
    kx, k1, k2, k3 = jax.random.split(key, 4)
    x = jax.random.normal(kx, (batch, seq, dim), dtype=jnp.float32)
    # deterministic "nn.Linear"-like init (uniform +-1/sqrt(fan_in)), no bias
    w1 = jax.random.uniform(k1, (hidden, dim), jnp.float32,
                            -1.0 / dim ** 0.5, 1.0 / dim ** 0.5)
    w2 = jax.random.uniform(k2, (dim, hidden), jnp.float32,
                            -1.0 / hidden ** 0.5, 1.0 / hidden ** 0.5)
    w3 = jax.random.uniform(k3, (hidden, dim), jnp.float32,
                            -1.0 / dim ** 0.5, 1.0 / dim ** 0.5)

    ref = reference_feed_forward(x, w1, w2, w3)

    # 1) f32, default tiles: single hidden tile (tile_h=512), fused gate weights.
    w13t, w2t, th = prepare_ffn_weights(w1, w2, w3, tile_h=512)
    out = jax.block_until_ready(feed_forward(x, w13t, w2t, tile_h=th))
    assert out.shape == (batch, seq, dim)
    assert jnp.allclose(out, ref, atol=5e-4, rtol=5e-4)

    # 2) f32, multiple token tiles AND multiple hidden tiles (exercises both
    #    grid axes, the fused/interleaved weight layout and the resident-output
    #    accumulation path).
    w13t_s, w2t_s, th_s = prepare_ffn_weights(w1, w2, w3, tile_h=256)
    out2 = jax.block_until_ready(
        feed_forward(x, w13t_s, w2t_s, tile_t=8, tile_h=th_s))
    assert jnp.allclose(out2, ref, atol=5e-4, rtol=5e-4)

    # 3) Token count not a multiple of the tile (padding path).
    x_odd = x[:, :5, :]                      # T = 10 -> padded
    ref_odd = reference_feed_forward(x_odd, w1, w2, w3)
    out3 = jax.block_until_ready(feed_forward(x_odd, w13t, w2t, tile_h=th))
    assert jnp.allclose(out3, ref_odd, atol=5e-4, rtol=5e-4)

    # 4) bf16 activations/weights (MXU bf16 path, f32 accumulation + f32 gate).
    xb = x.astype(jnp.bfloat16)
    w13b, w2b, thb = prepare_ffn_weights(
        w1.astype(jnp.bfloat16), w2.astype(jnp.bfloat16),
        w3.astype(jnp.bfloat16), tile_h=256)
    out_bf = jax.block_until_ready(feed_forward(xb, w13b, w2b, tile_h=thb))
    ref_bf = reference_feed_forward(
        xb.astype(jnp.float32),
        w1.astype(jnp.bfloat16).astype(jnp.float32),
        w2.astype(jnp.bfloat16).astype(jnp.float32),
        w3.astype(jnp.bfloat16).astype(jnp.float32))
    assert jnp.allclose(out_bf.astype(jnp.float32), ref_bf, atol=5e-2, rtol=5e-2)

    print("KERNEL_OK")
</pallas_src>

<mosaic_0001>
module attributes {stable_mosaic.version = 11 : i64} {
  func.func @_ffn_kernel(%arg0: i32, %arg1: i32, %arg2: memref<16x128xf32, #tpu.memory_space<vmem>>, %arg3: memref<128x1024xf32, #tpu.memory_space<vmem>>, %arg4: memref<512x128xf32, #tpu.memory_space<vmem>>, %arg5: memref<16x128xf32, #tpu.memory_space<vmem>>) attributes {dimension_semantics = [#tpu.dimension_semantics<parallel>, #tpu.dimension_semantics<arbitrary>], iteration_bounds = array<i64: 1, 1>, scalar_prefetch = 0 : i64, scratch_operands = 0 : i64, tpu.core_type = #tpu.core_type<tc>, window_params = [{transform_indices = @transform_0, window_bounds = array<i64: 16, 128>}, {transform_indices = @transform_1, window_bounds = array<i64: 128, 1024>}, {transform_indices = @transform_2, window_bounds = array<i64: 512, 128>}, {transform_indices = @transform_3, window_bounds = array<i64: 16, 128>}]} {
    %c0_i32 = arith.constant 0 : i32
    %0 = arith.cmpi eq, %arg1, %c0_i32 : i32
    %1 = arith.extui %0 : i1 to i32
    %c0_i32_0 = arith.constant 0 : i32
    %2 = arith.cmpi ne, %1, %c0_i32_0 : i32
    scf.if %2 {
      %cst_12 = arith.constant 0.000000e+00 : f32
      %20 = vector.broadcast %cst_12 : f32 to vector<16x128xf32>
      %c0_13 = arith.constant 0 : index
      %c0_14 = arith.constant 0 : index
      %21 = vector.load %arg5[%c0_13, %c0_14] : memref<16x128xf32, #tpu.memory_space<vmem>>, vector<16x128xf32>
      tpu.vector_store %arg5[%c0_13, %c0_14], %20 {strides = array<i32>} : memref<16x128xf32, #tpu.memory_space<vmem>>, vector<16x128xf32>,
    } else {
    }
    %c0 = arith.constant 0 : index
    %c0_1 = arith.constant 0 : index
    %3 = vector.load %arg2[%c0, %c0_1] : memref<16x128xf32, #tpu.memory_space<vmem>>, vector<16x128xf32>
    %c0_2 = arith.constant 0 : index
    %c0_3 = arith.constant 0 : index
    %4 = vector.load %arg3[%c0_2, %c0_3] : memref<128x1024xf32, #tpu.memory_space<vmem>>, vector<128x1024xf32>
    %cst = arith.constant dense<0.000000e+00> : vector<16x1024xf32>
    %5 = tpu.matmul %3, %4, %cst {dimension_numbers = #tpu.dot_dimension_numbers<[1], [0], [0], [1], [0, 0, 1, 1], [], []>} : vector<16x128xf32>, vector<128x1024xf32>, vector<16x1024xf32> -> vector<16x1024xf32>
    %6 = vector.extract_strided_slice %5 {offsets = [0, 0], sizes = [16, 512], strides = [1, 1]} : vector<16x1024xf32> to vector<16x512xf32>
    %7 = vector.extract_strided_slice %5 {offsets = [0, 512], sizes = [16, 512], strides = [1, 1]} : vector<16x1024xf32> to vector<16x512xf32>
    %8 = arith.negf %6 : vector<16x512xf32>
    %9 = math.exp %8 : vector<16x512xf32>
    %cst_4 = arith.constant 1.000000e+00 : f32
    %10 = vector.broadcast %cst_4 : f32 to vector<16x512xf32>
    %11 = arith.addf %10, %9 : vector<16x512xf32>
    %12 = arith.divf %10, %11 : vector<16x512xf32>
    %13 = arith.mulf %6, %12 : vector<16x512xf32>
    %14 = arith.mulf %13, %7 : vector<16x512xf32>
    %c0_5 = arith.constant 0 : index
    %c0_6 = arith.constant 0 : index
    %15 = vector.load %arg5[%c0_5, %c0_6] : memref<16x128xf32, #tpu.memory_space<vmem>>, vector<16x128xf32>
    %c0_7 = arith.constant 0 : index
    %c0_8 = arith.constant 0 : index
    %16 = vector.load %arg4[%c0_7, %c0_8] : memref<512x128xf32, #tpu.memory_space<vmem>>, vector<512x128xf32>
    %cst_9 = arith.constant dense<0.000000e+00> : vector<16x128xf32>
    %17 = tpu.matmul %14, %16, %cst_9 {dimension_numbers = #tpu.dot_dimension_numbers<[1], [0], [0], [1], [0, 0, 1, 1], [], []>} : vector<16x512xf32>, vector<512x128xf32>, vector<16x128xf32> -> vector<16x128xf32>
    %18 = arith.addf %15, %17 : vector<16x128xf32>
    %c0_10 = arith.constant 0 : index
    %c0_11 = arith.constant 0 : index
    %19 = vector.load %arg5[%c0_10, %c0_11] : memref<16x128xf32, #tpu.memory_space<vmem>>, vector<16x128xf32>
    tpu.vector_store %arg5[%c0_10, %c0_11], %18 {strides = array<i32>} : memref<16x128xf32, #tpu.memory_space<vmem>>, vector<16x128xf32>,
    return
  }
  func.func @transform_0(%arg0: i32, %arg1: i32) -> (i32, i32) {
    %c0_i32 = arith.constant 0 : i32
    %c0_i32_0 = arith.constant 0 : i32
    return %arg0, %c0_i32 : i32, i32
  }
  func.func @transform_1(%arg0: i32, %arg1: i32) -> (i32, i32) {
    %c0_i32 = arith.constant 0 : i32
    %c0_i32_0 = arith.constant 0 : i32
    return %c0_i32, %arg1 : i32, i32
  }
  func.func @transform_2(%arg0: i32, %arg1: i32) -> (i32, i32) {
    %c0_i32 = arith.constant 0 : i32
    %c0_i32_0 = arith.constant 0 : i32
    return %arg1, %c0_i32 : i32, i32
  }
  func.func @transform_3(%arg0: i32, %arg1: i32) -> (i32, i32) {
    %c0_i32 = arith.constant 0 : i32
    %c0_i32_0 = arith.constant 0 : i32
    return %arg0, %c0_i32 : i32, i32
  }
}

</mosaic_0001>

<bundles_post_ra>
// kernel: feed_forward.1
= control target key start
LH: loop header
LB: loop body
LE: loop exit
PB: predicated region body
PF: predicated region fallthrough
CT: control target
= control target key end

     0   :  { %8 = vsyncpa [#allocation3], 0  ;;  %s1319_s0 = inlined_call_operand.hbm [shape: f32[16,128], index: 0, kind: input, shape index: {}]   ;;  %s1320_s1 = inlined_call_operand.hbm [shape: f32[128,1024], index: 1, kind: input, shape index: {}]   ;;  %s1321_s2 = inlined_call_operand.hbm [shape: f32[512,128], index: 2, kind: input, shape index: {}]   ;;  %s1322_s3 = inlined_call_operand.hbm [shape: f32[16,128], index: 3, kind: output, shape index: {}]  }
   0x1   :  { %9 = vsyncpa [#allocation6], 0 }
   0x2   :  { %10 = vsyncpa [#allocation4], 0  ;;  %s1213_s12 = smov [#allocation5]   ;;  %s1119_s16 = scalar_lea.hbm %s1320_s1, 16384 }
   0x3   :  { %s28_s13 = sshll.u32 %s1213_s12, 4  ;;  %p1120_p0 = scmp.ne.s32.totalorder %s1320_s1, %s1119_s16  ;;  %s29_s13 = int_to_ptr.vmem [resolvable:$true] %s28_s13 }
   0x4   :  { %p1123_p1 = scmp.lt.u32.totalorder %s1119_s16, %s1320_s1 }
   0x6   :  { %p1125_p2 = pnand %p1123_p1, %p1120_p0 }
   0x8   :  { %1128 = shalt.err (!%p1125_p2)
}
   0x9   :  { %s1129_s21 = scalar_lea.vmem %s29_s13, 16384  ;;  %p1134_p4 = scmp.lt.s32.totalorder %s29_s13, %s29_s13 }
   0xa   :  { %p1130_p3 = scmp.ne.s32.totalorder %s29_s13, %s1129_s21  ;;  %p1135_p5 = scmp.lt.s32.totalorder %s1129_s21, %s1129_s21 }
   0xc   :  { %p1136_p6 = por %p1135_p5, %p1134_p4 }
   0xe   :  { %p1137_p7 = pnand %p1136_p6, %p1130_p3 }
  0x10   :  { %1140 = shalt.err (!%p1137_p7)
}
  0x11   :  { %s1214_s22 = smov 1024   ;;  %s1215_s23 = smov 64  }
  0x12   :  { %34 = dma.hbm_to_vmem [thread:$0]  %s1320_s1, 16384, %s29_s13, [#allocation6], %s1214_s22, %s1214_s22, %s1215_s23  }
  0x13   :  { %s1216_s26 = smov [#allocation2]   ;;  %s1141_s30 = scalar_lea.hbm %s1319_s0, 256 }
  0x14   :  { %s16_s27 = sshll.u32 %s1216_s26, 4  ;;  %p1142_p8 = scmp.ne.s32.totalorder %s1319_s0, %s1141_s30  ;;  %s17_s27 = int_to_ptr.vmem [resolvable:$true] %s16_s27 }
  0x15   :  { %p1145_p9 = scmp.lt.u32.totalorder %s1141_s30, %s1319_s0 }
  0x17   :  { %p1147_p10 = pnand %p1145_p9, %p1142_p8 }
  0x19   :  { %1150 = shalt.err (!%p1147_p10)
}
  0x1a   :  { %s1151_s8 = scalar_lea.vmem %s17_s27, 256  ;;  %p1156_p12 = scmp.lt.s32.totalorder %s17_s27, %s17_s27 }
  0x1b   :  { %p1152_p11 = scmp.ne.s32.totalorder %s17_s27, %s1151_s8  ;;  %p1157_p13 = scmp.lt.s32.totalorder %s1151_s8, %s1151_s8 }
  0x1d   :  { %p1158_p0 = por %p1157_p13, %p1156_p12 }
  0x1f   :  { %p1159_p1 = pnand %p1158_p0, %p1152_p11 }
  0x21   :  { %1162 = shalt.err (!%p1159_p1)
}
  0x22   :  { %s1217_s1 = smov 128   ;;  %s1218_s9 = smov 8  }
  0x23   :  { %22 = dma.hbm_to_vmem [thread:$0]  %s1319_s0, 256, %s17_s27, [#allocation3], %s1217_s1, %s1217_s1, %s1218_s9  }
  0x24   :  { %s1219_s12 = smov [#allocation7]   ;;  %s1163_s16 = scalar_lea.hbm %s1321_s2, 8192 }
  0x25   :  { %s40_s13 = sshll.u32 %s1219_s12, 4  ;;  %p1164_p2 = scmp.ne.s32.totalorder %s1321_s2, %s1163_s16  ;;  %s41_s13 = int_to_ptr.vmem [resolvable:$true] %s40_s13 }
  0x26   :  { %p1167_p3 = scmp.lt.u32.totalorder %s1163_s16, %s1321_s2 }
  0x28   :  { %p1169_p4 = pnand %p1167_p3, %p1164_p2 }
  0x2a   :  { %1172 = shalt.err (!%p1169_p4)
}
  0x2b   :  { %s1173_s21 = scalar_lea.vmem %s41_s13, 8192  ;;  %p1178_p6 = scmp.lt.s32.totalorder %s41_s13, %s41_s13 }
  0x2c   :  { %p1174_p5 = scmp.ne.s32.totalorder %s41_s13, %s1173_s21  ;;  %p1179_p7 = scmp.lt.s32.totalorder %s1173_s21, %s1173_s21 }
  0x2e   :  { %p1180_p8 = por %p1179_p7, %p1178_p6 }
  0x30   :  { %p1181_p9 = pnand %p1180_p8, %p1174_p5 }
  0x32   :  { %1184 = shalt.err (!%p1181_p9)
}
  0x33   :  { %46 = dma.hbm_to_vmem [thread:$0]  %s1321_s2, 8192, %s41_s13, [#allocation6], %s1217_s1, %s1217_s1, %s1218_s9  }
  0x34   :  { %1207 = dma.done.wait [#allocation3], 256  }
  0x35   :  { %1208 = vsyncadd [#allocation3], 4294967040 }
  0x36   :  { %1209 = dma.done.wait [#allocation6], 24576  }
  0x37   :  { %1210 = vsyncadd [#allocation6], 4294942720  ;;  %v1220_v0 = vmov 0.0   ;;  %v65_v1 = vld [vmem:[#allocation5 + $0x8] sm:$0xff]  ;;  %v67_v3 = vld [vmem:[#allocation5 + $0x18] sm:$0xff]  ;;  %s1221_s2 = smov [#allocation8]  }
  0x38   :  { %256 = vmatprep.mubr.f32.mxu0 %v1220_v0  ;;  %333 = vmatprep.mubr.f32.mxu1 %v1220_v0  ;;  %v73_v2 = vld [vmem:[#allocation5 + $0x48] sm:$0xff]  ;;  %v75_v5 = vld [vmem:[#allocation5 + $0x58] sm:$0xff]  ;;  %v64_v6 = vld [vmem:[#allocation5] sm:$0xff]  ;;  %s789_s23 = sshll.u32 %s1221_s2, 4  ;;  %s790_s23 = int_to_ptr.vmem [resolvable:$true] %s789_s23 }
  0x39   :  { %v886_v4 = vpack.c.bf16 %v73_v2, %v65_v1  ;;  %v72_v7 = vld [vmem:[#allocation5 + $0x40] sm:$0xff]  ;;  %v918_v8 = vpack.c.bf16 %v75_v5, %v67_v3  ;;  %v66_v10 = vld [vmem:[#allocation5 + $0x10] sm:$0xff]  ;;  %v81_v12 = vld [vmem:[#allocation5 + $0x88] sm:$0xff]  ;;  %s1185_s24 = scalar_lea.vmem %s790_s23, 256  ;;  %p1190_p11 = scmp.lt.s32.totalorder %s790_s23, %s790_s23 }
  0x3a   :  { %v888_v9 = vpack.c.bf16 %v72_v7, %v64_v6  ;;  %v74_v11 = vld [vmem:[#allocation5 + $0x50] sm:$0xff]  ;;  %v89_v14 = vld [vmem:[#allocation5 + $0xc8] sm:$0xff]  ;;  %v83_v15 = vld [vmem:[#allocation5 + $0x98] sm:$0xff]  ;;  %p1186_p10 = scmp.ne.s32.totalorder %s790_s23, %s1185_s24  ;;  %p1191_p12 = scmp.lt.s32.totalorder %s1185_s24, %s1185_s24 }
  0x3b   :  { %887 = vmatprep.subr.bf16.mxu0 %v886_v4  ;;  %v920_v13 = vpack.c.bf16 %v74_v11, %v66_v10  ;;  %v91_v16 = vld [vmem:[#allocation5 + $0xd8] sm:$0xff]  ;;  %919 = vmatprep.subr.bf16.mxu1 %v918_v8  ;;  %v890_v17 = vpack.c.bf16 %v89_v14, %v81_v12  ;;  %v80_v19 = vld [vmem:[#allocation5 + $0x80] sm:$0xff]  ;;  %v82_v21 = vld [vmem:[#allocation5 + $0x90] sm:$0xff] }
  0x3c   :  { %889 = vmatpush1.bf16.msra.mxu0 %v888_v9  ;;  %v922_v18 = vpack.c.bf16 %v91_v16, %v83_v15  ;;  %v88_v20 = vld [vmem:[#allocation5 + $0xc0] sm:$0xff]  ;;  %v90_v23 = vld [vmem:[#allocation5 + $0xd0] sm:$0xff]  ;;  %v97_v24 = vld [vmem:[#allocation5 + $0x108] sm:$0xff]  ;;  %p1192_p13 = por %p1191_p12, %p1190_p11 }
  0x3d   :  { %921 = vmatpush1.bf16.msra.mxu1 %v920_v13  ;;  %v892_v22 = vpack.c.bf16 %v88_v20, %v80_v19  ;;  %v105_v25 = vld [vmem:[#allocation5 + $0x148] sm:$0xff]  ;;  %891 = vmatprep.subr.bf16.mxu0 %v890_v17  ;;  %v924_v26 = vpack.c.bf16 %v90_v23, %v82_v21  ;;  %v99_v28 = vld [vmem:[#allocation5 + $0x118] sm:$0xff]  ;;  %v96_v30 = vld [vmem:[#allocation5 + $0x100] sm:$0xff] }
  0x3e   :  { %923 = vmatprep.subr.bf16.mxu1 %v922_v18  ;;  %v894_v27 = vpack.c.bf16 %v105_v25, %v97_v24  ;;  %v107_v29 = vld [vmem:[#allocation5 + $0x158] sm:$0xff]  ;;  %v104_v32 = vld [vmem:[#allocation5 + $0x140] sm:$0xff]  ;;  %v98_v33 = vld [vmem:[#allocation5 + $0x110] sm:$0xff]  ;;  %p1193_p0 = pnand %p1192_p13, %p1186_p10 }
  0x3f   :  { %v926_v31 = vpack.c.bf16 %v107_v29, %v99_v28  ;;  %v106_v34 = vld [vmem:[#allocation5 + $0x150] sm:$0xff]  ;;  %v896_v35 = vpack.c.bf16 %v104_v32, %v96_v30  ;;  %v113_v36 = vld [vmem:[#allocation5 + $0x188] sm:$0xff]  ;;  %v115_v38 = vld [vmem:[#allocation5 + $0x198] sm:$0xff] }
  0x40   :  { %893 = vmatpush1.bf16.msra.mxu0 %v892_v22  ;;  %v121_v37 = vld [vmem:[#allocation5 + $0x1c8] sm:$0xff]  ;;  %v928_v39 = vpack.c.bf16 %v106_v34, %v98_v33  ;;  %v123_v41 = vld [vmem:[#allocation5 + $0x1d8] sm:$0xff]  ;;  %v112_v42 = vld [vmem:[#allocation5 + $0x180] sm:$0xff] }
  0x41   :  { %925 = vmatpush1.bf16.msra.mxu1 %v924_v26  ;;  %895 = vmatprep.subr.bf16.mxu0 %v894_v27  ;;  %v898_v40 = vpack.c.bf16 %v121_v37, %v113_v36  ;;  %v120_v43 = vld [vmem:[#allocation5 + $0x1c0] sm:$0xff]  ;;  %v930_v44 = vpack.c.bf16 %v123_v41, %v115_v38  ;;  %v114_v45 = vld [vmem:[#allocation5 + $0x190] sm:$0xff]  ;;  %v129_v47 = vld [vmem:[#allocation5 + $0x208] sm:$0xff] }
  0x42   :  { %927 = vmatprep.subr.bf16.mxu1 %v926_v31  ;;  %v122_v46 = vld [vmem:[#allocation5 + $0x1d0] sm:$0xff]  ;;  %v137_v48 = vld [vmem:[#allocation5 + $0x248] sm:$0xff]  ;;  %v131_v49 = vld [vmem:[#allocation5 + $0x218] sm:$0xff]  ;;  %v900_v51 = vpack.c.bf16 %v120_v43, %v112_v42 }
  0x43   :  { %v139_v50 = vld [vmem:[#allocation5 + $0x258] sm:$0xff]  ;;  %v932_v52 = vpack.c.bf16 %v122_v46, %v114_v45  ;;  %v902_v53 = vpack.c.bf16 %v137_v48, %v129_v47  ;;  %v128_v54 = vld [vmem:[#allocation5 + $0x200] sm:$0xff]  ;;  %v130_v56 = vld [vmem:[#allocation5 + $0x210] sm:$0xff] }
  0x44   :  { %897 = vmatpush1.bf16.msra.mxu0 %v896_v35  ;;  %v136_v55 = vld [vmem:[#allocation5 + $0x240] sm:$0xff]  ;;  %v934_v57 = vpack.c.bf16 %v139_v50, %v131_v49  ;;  %v138_v58 = vld [vmem:[#allocation5 + $0x250] sm:$0xff]  ;;  %v145_v59 = vld [vmem:[#allocation5 + $0x288] sm:$0xff] }
  0x45   :  { %929 = vmatpush1.bf16.msra.mxu1 %v928_v39  ;;  %899 = vmatprep.subr.bf16.mxu0 %v898_v40  ;;  %v153_v60 = vld [vmem:[#allocation5 + $0x2c8] sm:$0xff]  ;;  %v147_v61 = vld [vmem:[#allocation5 + $0x298] sm:$0xff]  ;;  %v904_v63 = vpack.c.bf16 %v136_v55, %v128_v54  ;;  %v936_v1 = vpack.c.bf16 %v138_v58, %v130_v56  ;;  %v144_v3 = vld [vmem:[#allocation5 + $0x280] sm:$0xff] }
  0x46   :  { %931 = vmatprep.subr.bf16.mxu1 %v930_v44  ;;  %v155_v62 = vld [vmem:[#allocation5 + $0x2d8] sm:$0xff]  ;;  %v906_v2 = vpack.c.bf16 %v153_v60, %v145_v59  ;;  %v152_v4 = vld [vmem:[#allocation5 + $0x2c0] sm:$0xff]  ;;  %v146_v5 = vld [vmem:[#allocation5 + $0x290] sm:$0xff] }
  0x47   :  { %v938_v6 = vpack.c.bf16 %v155_v62, %v147_v61  ;;  %v154_v7 = vld [vmem:[#allocation5 + $0x2d0] sm:$0xff]  ;;  %v161_v8 = vld [vmem:[#allocation5 + $0x308] sm:$0xff]  ;;  %v163_v10 = vld [vmem:[#allocation5 + $0x318] sm:$0xff]  ;;  %v908_v12 = vpack.c.bf16 %v152_v4, %v144_v3 }
  0x48   :  { %901 = vmatpush1.bf16.msra.mxu0 %v900_v51  ;;  %v169_v9 = vld [vmem:[#allocation5 + $0x348] sm:$0xff]  ;;  %v171_v11 = vld [vmem:[#allocation5 + $0x358] sm:$0xff]  ;;  %v940_v13 = vpack.c.bf16 %v154_v7, %v146_v5  ;;  %v160_v15 = vld [vmem:[#allocation5 + $0x300] sm:$0xff] }
  0x49   :  { %933 = vmatpush1.bf16.msra.mxu1 %v932_v52  ;;  %903 = vmatprep.subr.bf16.mxu0 %v902_v53  ;;  %v910_v14 = vpack.c.bf16 %v169_v9, %v161_v8  ;;  %v168_v16 = vld [vmem:[#allocation5 + $0x340] sm:$0xff]  ;;  %v162_v17 = vld [vmem:[#allocation5 + $0x310] sm:$0xff]  ;;  %v942_v18 = vpack.c.bf16 %v171_v11, %v163_v10  ;;  %v177_v20 = vld [vmem:[#allocation5 + $0x388] sm:$0xff] }
  0x4a   :  { %935 = vmatprep.subr.bf16.mxu1 %v934_v57  ;;  %v170_v19 = vld [vmem:[#allocation5 + $0x350] sm:$0xff]  ;;  %v185_v21 = vld [vmem:[#allocation5 + $0x3c8] sm:$0xff]  ;;  %v179_v22 = vld [vmem:[#allocation5 + $0x398] sm:$0xff]  ;;  %v912_v24 = vpack.c.bf16 %v168_v16, %v160_v15 }
  0x4b   :  { %v187_v23 = vld [vmem:[#allocation5 + $0x3d8] sm:$0xff]  ;;  %v944_v25 = vpack.c.bf16 %v170_v19, %v162_v17  ;;  %v914_v26 = vpack.c.bf16 %v185_v21, %v177_v20  ;;  %v176_v27 = vld [vmem:[#allocation5 + $0x380] sm:$0xff]  ;;  %v178_v29 = vld [vmem:[#allocation5 + $0x390] sm:$0xff] }
  0x4c   :  { %905 = vmatpush1.bf16.msra.mxu0 %v904_v63  ;;  %v184_v28 = vld [vmem:[#allocation5 + $0x3c0] sm:$0xff]  ;;  %v946_v30 = vpack.c.bf16 %v187_v23, %v179_v22  ;;  %v186_v31 = vld [vmem:[#allocation5 + $0x3d0] sm:$0xff]  ;;  %v69_v32 = vld [vmem:[#allocation5 + $0x28] sm:$0xff] }
  0x4d   :  { %937 = vmatpush1.bf16.msra.mxu1 %v936_v1  ;;  %907 = vmatprep.subr.bf16.mxu0 %v906_v2  ;;  %v77_v33 = vld [vmem:[#allocation5 + $0x68] sm:$0xff]  ;;  %v71_v34 = vld [vmem:[#allocation5 + $0x38] sm:$0xff]  ;;  %v916_v36 = vpack.c.bf16 %v184_v28, %v176_v27  ;;  %v948_v37 = vpack.c.bf16 %v186_v31, %v178_v29  ;;  %v68_v39 = vld [vmem:[#allocation5 + $0x20] sm:$0xff] }
  0x4e   :  { %939 = vmatprep.subr.bf16.mxu1 %v938_v6  ;;  %v79_v35 = vld [vmem:[#allocation5 + $0x78] sm:$0xff]  ;;  %v950_v38 = vpack.c.bf16 %v77_v33, %v69_v32  ;;  %v76_v40 = vld [vmem:[#allocation5 + $0x60] sm:$0xff]  ;;  %v70_v42 = vld [vmem:[#allocation5 + $0x30] sm:$0xff] }
  0x4f   :  { %v982_v41 = vpack.c.bf16 %v79_v35, %v71_v34  ;;  %v78_v43 = vld [vmem:[#allocation5 + $0x70] sm:$0xff]  ;;  %v85_v44 = vld [vmem:[#allocation5 + $0xa8] sm:$0xff]  ;;  %v952_v47 = vpack.c.bf16 %v76_v40, %v68_v39  ;;  %v87_v48 = vld [vmem:[#allocation5 + $0xb8] sm:$0xff] }
  0x50   :  { %909 = vmatpush1.bf16.msra.mxu0 %v908_v12  ;;  %v93_v45 = vld [vmem:[#allocation5 + $0xe8] sm:$0xff]  ;;  %v1286_v46 = vld [vmem:[#allocation2] sm:$0xff]  ;;  %v95_v49 = vld [vmem:[#allocation5 + $0xf8] sm:$0xff]  ;;  %v984_v50 = vpack.c.bf16 %v78_v43, %v70_v42 }
  0x51   :  { %941 = vmatpush1.bf16.msra.mxu1 %v940_v13  ;;  %911 = vmatprep.subr.bf16.mxu0 %v910_v14  ;;  %v84_v51 = vld [vmem:[#allocation5 + $0xa0] sm:$0xff]  ;;  %v86_v53 = vld [vmem:[#allocation5 + $0xb0] sm:$0xff]  ;;  %v954_v54 = vpack.c.bf16 %v93_v45, %v85_v44  ;;  %v101_v56 = vld [vmem:[#allocation5 + $0x128] sm:$0xff]  ;;  %v986_v58 = vpack.c.bf16 %v95_v49, %v87_v48 }
  0x52   :  { %943 = vmatprep.subr.bf16.mxu1 %v942_v18  ;;  %v92_v52 = vld [vmem:[#allocation5 + $0xe0] sm:$0xff]  ;;  %v94_v55 = vld [vmem:[#allocation5 + $0xf0] sm:$0xff]  ;;  %v109_v57 = vld [vmem:[#allocation5 + $0x168] sm:$0xff] }
  0x53   :  { %v103_v59 = vld [vmem:[#allocation5 + $0x138] sm:$0xff]  ;;  %v956_v62 = vpack.c.bf16 %v92_v52, %v84_v51  ;;  %v988_v63 = vpack.c.bf16 %v94_v55, %v86_v53  ;;  %v958_v1 = vpack.c.bf16 %v109_v57, %v101_v56  ;;  %v100_v2 = vld [vmem:[#allocation5 + $0x120] sm:$0xff]  ;;  %v102_v4 = vld [vmem:[#allocation5 + $0x130] sm:$0xff] }
  0x54   :  { %913 = vmatpush1.bf16.msra.mxu0 %v912_v24  ;;  %v111_v60 = vld [vmem:[#allocation5 + $0x178] sm:$0xff]  ;;  %v108_v3 = vld [vmem:[#allocation5 + $0x160] sm:$0xff]  ;;  %v110_v6 = vld [vmem:[#allocation5 + $0x170] sm:$0xff] }
  0x55   :  { %945 = vmatpush1.bf16.msra.mxu1 %v944_v25  ;;  %915 = vmatprep.subr.bf16.mxu0 %v914_v26  ;;  %v1290_v61 = vld [vmem:[#allocation2 + $0x8] sm:$0xff]  ;;  %v990_v5 = vpack.c.bf16 %v111_v60, %v103_v59  ;;  %v117_v7 = vld [vmem:[#allocation5 + $0x1a8] sm:$0xff]  ;;  %v960_v11 = vpack.c.bf16 %v108_v3, %v100_v2  ;;  %v992_v12 = vpack.c.bf16 %v110_v6, %v102_v4  ;;  %v116_v14 = vld [vmem:[#allocation5 + $0x1a0] sm:$0xff] }
  0x56   :  { %947 = vmatprep.subr.bf16.mxu1 %v946_v30  ;;  %v125_v8 = vld [vmem:[#allocation5 + $0x1e8] sm:$0xff]  ;;  %v119_v9 = vld [vmem:[#allocation5 + $0x1b8] sm:$0xff]  ;;  %v124_v15 = vld [vmem:[#allocation5 + $0x1e0] sm:$0xff] }
  0x57   :  { %v127_v10 = vld [vmem:[#allocation5 + $0x1f8] sm:$0xff]  ;;  %v962_v13 = vpack.c.bf16 %v125_v8, %v117_v7  ;;  %v118_v16 = vld [vmem:[#allocation5 + $0x1b0] sm:$0xff]  ;;  %v133_v19 = vld [vmem:[#allocation5 + $0x228] sm:$0xff]  ;;  %v964_v23 = vpack.c.bf16 %v124_v15, %v116_v14 }
  0x58   :  { %917 = vmatpush1.bf16.msra.mxu0 %v916_v36  ;;  %v994_v17 = vpack.c.bf16 %v127_v10, %v119_v9  ;;  %v126_v18 = vld [vmem:[#allocation5 + $0x1f0] sm:$0xff]  ;;  %v141_v20 = vld [vmem:[#allocation5 + $0x268] sm:$0xff]  ;;  %v135_v21 = vld [vmem:[#allocation5 + $0x238] sm:$0xff] }
  0x59   :  { %949 = vmatpush1.bf16.msra.mxu1 %v948_v37  ;;  %951 = vmatprep.subr.bf16.mxu0 %v950_v38  ;;  %v143_v22 = vld [vmem:[#allocation5 + $0x278] sm:$0xff]  ;;  %v996_v24 = vpack.c.bf16 %v126_v18, %v118_v16  ;;  %v966_v25 = vpack.c.bf16 %v141_v20, %v133_v19  ;;  %v132_v26 = vld [vmem:[#allocation5 + $0x220] sm:$0xff]  ;;  %v134_v28 = vld [vmem:[#allocation5 + $0x230] sm:$0xff] }
  0x5a   :  { %983 = vmatprep.subr.bf16.mxu1 %v982_v41  ;;  %v140_v27 = vld [vmem:[#allocation5 + $0x260] sm:$0xff]  ;;  %v998_v29 = vpack.c.bf16 %v143_v22, %v135_v21  ;;  %v142_v30 = vld [vmem:[#allocation5 + $0x270] sm:$0xff]  ;;  %v149_v31 = vld [vmem:[#allocation5 + $0x2a8] sm:$0xff] }
  0x5b   :  { %257 = vmatmul.mubr.f32.vlgmr.msra.gmra.mrb[0].mxu0 %v1286_v46  ;;  %v157_v32 = vld [vmem:[#allocation5 + $0x2e8] sm:$0xff]  ;;  %v151_v33 = vld [vmem:[#allocation5 + $0x2b8] sm:$0xff]  ;;  %v968_v35 = vpack.c.bf16 %v140_v27, %v132_v26  ;;  %v1000_v36 = vpack.c.bf16 %v142_v30, %v134_v28  ;;  %v148_v38 = vld [vmem:[#allocation5 + $0x2a0] sm:$0xff] }
  0x5c   :  { %334 = vmatmul.mubr.f32.vlgmr.msra.gmra.mrb[0].mxu1 %v1286_v46  ;;  %953 = vmatpush1.bf16.msra.mxu0 %v952_v47  ;;  %v159_v34 = vld [vmem:[#allocation5 + $0x2f8] sm:$0xff]  ;;  %v970_v37 = vpack.c.bf16 %v157_v32, %v149_v31  ;;  %v156_v39 = vld [vmem:[#allocation5 + $0x2e0] sm:$0xff]  ;;  %v150_v40 = vld [vmem:[#allocation5 + $0x2b0] sm:$0xff] }
  0x5d   :  { %985 = vmatpush1.bf16.msra.mxu1 %v984_v50  ;;  %262 = vmatprep.mubr.f32.mxu0 %v1220_v0  ;;  %v1002_v41 = vpack.c.bf16 %v159_v34, %v151_v33  ;;  %v158_v42 = vld [vmem:[#allocation5 + $0x2f0] sm:$0xff]  ;;  %v165_v43 = vld [vmem:[#allocation5 + $0x328] sm:$0xff]  ;;  %v167_v45 = vld [vmem:[#allocation5 + $0x338] sm:$0xff]  ;;  %v972_v48 = vpack.c.bf16 %v156_v39, %v148_v38 }
  0x5e   :  { %339 = vmatprep.mubr.f32.mxu1 %v1220_v0  ;;  %955 = vmatprep.subr.bf16.mxu0 %v954_v54  ;;  %v173_v44 = vld [vmem:[#allocation5 + $0x368] sm:$0xff]  ;;  %v175_v47 = vld [vmem:[#allocation5 + $0x378] sm:$0xff]  ;;  %v1004_v49 = vpack.c.bf16 %v158_v42, %v150_v40  ;;  %v164_v51 = vld [vmem:[#allocation5 + $0x320] sm:$0xff] }
  0x5f   :  { %263 = vmatmul.mubr.f32.gmra.mrb[2].mxu0 %v1290_v61  ;;  %987 = vmatprep.subr.bf16.mxu1 %v986_v58  ;;  %v974_v50 = vpack.c.bf16 %v173_v44, %v165_v43  ;;  %v172_v52 = vld [vmem:[#allocation5 + $0x360] sm:$0xff]  ;;  %v166_v53 = vld [vmem:[#allocation5 + $0x330] sm:$0xff]  ;;  %v1006_v54 = vpack.c.bf16 %v175_v47, %v167_v45  ;;  %v181_v56 = vld [vmem:[#allocation5 + $0x3a8] sm:$0xff] }
  0x60   :  { %340 = vmatmul.mubr.f32.gmra.mrb[2].mxu1 %v1290_v61  ;;  %957 = vmatpush1.bf16.msra.mxu0 %v956_v62  ;;  %v174_v55 = vld [vmem:[#allocation5 + $0x370] sm:$0xff]  ;;  %v189_v57 = vld [vmem:[#allocation5 + $0x3e8] sm:$0xff]  ;;  %v183_v58 = vld [vmem:[#allocation5 + $0x3b8] sm:$0xff]  ;;  %v976_v60 = vpack.c.bf16 %v172_v52, %v164_v51 }
  0x61   :  { %989 = vmatpush1.bf16.msra.mxu1 %v988_v63  ;;  %959 = vmatprep.subr.bf16.mxu0 %v958_v1  ;;  %v191_v59 = vld [vmem:[#allocation5 + $0x3f8] sm:$0xff]  ;;  %v1008_v62 = vpack.c.bf16 %v174_v55, %v166_v53  ;;  %v978_v63 = vpack.c.bf16 %v189_v57, %v181_v56  ;;  %v180_v1 = vld [vmem:[#allocation5 + $0x3a0] sm:$0xff]  ;;  %v182_v4 = vld [vmem:[#allocation5 + $0x3b0] sm:$0xff] }
  0x62   :  { %991 = vmatprep.subr.bf16.mxu1 %v990_v5  ;;  %410 = vmatprep.mubr.f32.mxu0 %v1220_v0  ;;  %v188_v2 = vld [vmem:[#allocation5 + $0x3e0] sm:$0xff]  ;;  %v1010_v3 = vpack.c.bf16 %v191_v59, %v183_v58  ;;  %v190_v5 = vld [vmem:[#allocation5 + $0x3f0] sm:$0xff]  ;;  %v583_v9 = vld [vmem:[#allocation7 + $0x88] sm:$0xff] }
  0x63   :  { %487 = vmatprep.mubr.f32.mxu1 %v1220_v0  ;;  %v980_v6 = vpack.c.bf16 %v188_v2, %v180_v1  ;;  %v1012_v7 = vpack.c.bf16 %v190_v5, %v182_v4  ;;  %v582_v8 = vld [vmem:[#allocation7 + $0x80] sm:$0xff]  ;;  %v567_v14 = vld [vmem:[#allocation7 + $0x8] sm:$0xff]  ;;  %v585_v19 = vld [vmem:[#allocation7 + $0x98] sm:$0xff] }
  0x64   :  { %961 = vmatpush1.bf16.msra.mxu0 %v960_v11  ;;  %v614_v10 = vld [vmem:[#allocation7 + $0x180] sm:$0xff]  ;;  %v1014_v11 = vpack.c.bf16 %v583_v9, %v582_v8  ;;  %v599_v18 = vld [vmem:[#allocation7 + $0x108] sm:$0xff]  ;;  %v616_v20 = vld [vmem:[#allocation7 + $0x190] sm:$0xff] }
  0x65   :  { %993 = vmatpush1.bf16.msra.mxu1 %v992_v12  ;;  %963 = vmatprep.subr.bf16.mxu0 %v962_v13  ;;  %v615_v12 = vld [vmem:[#allocation7 + $0x188] sm:$0xff]  ;;  %v566_v13 = vld [vmem:[#allocation7] sm:$0xff]  ;;  %v617_v21 = vld [vmem:[#allocation7 + $0x198] sm:$0xff] }
  0x66   :  { %995 = vmatprep.subr.bf16.mxu1 %v994_v17  ;;  %v1046_v15 = vpack.c.bf16 %v615_v12, %v614_v10  ;;  %v1016_v16 = vpack.c.bf16 %v567_v14, %v566_v13  ;;  %v598_v17 = vld [vmem:[#allocation7 + $0x100] sm:$0xff]  ;;  %v568_v22 = vld [vmem:[#allocation7 + $0x10] sm:$0xff]  ;;  %v601_v27 = vld [vmem:[#allocation7 + $0x118] sm:$0xff] }
  0x67   :  { %v600_v26 = vld [vmem:[#allocation7 + $0x110] sm:$0xff]  ;;  %v587_v30 = vld [vmem:[#allocation7 + $0xa8] sm:$0xff]  ;;  %v618_v31 = vld [vmem:[#allocation7 + $0x1a0] sm:$0xff] }
  0x68   :  { %965 = vmatpush1.bf16.msra.mxu0 %v964_v23  ;;  %v569_v23 = vld [vmem:[#allocation7 + $0x18] sm:$0xff]  ;;  %v1052_v28 = vpack.c.bf16 %v601_v27, %v600_v26  ;;  %v619_v33 = vld [vmem:[#allocation7 + $0x1a8] sm:$0xff]  ;;  %v570_v34 = vld [vmem:[#allocation7 + $0x20] sm:$0xff] }
  0x69   :  { %997 = vmatpush1.bf16.msra.mxu1 %v996_v24  ;;  %967 = vmatprep.subr.bf16.mxu0 %v966_v25  ;;  %v1050_v24 = vpack.c.bf16 %v617_v21, %v616_v20  ;;  %v1020_v25 = vpack.c.bf16 %v569_v23, %v568_v22  ;;  %v602_v38 = vld [vmem:[#allocation7 + $0x120] sm:$0xff]  ;;  %v603_v39 = vld [vmem:[#allocation7 + $0x128] sm:$0xff]  ;;  %v589_v42 = vld [vmem:[#allocation7 + $0xb8] sm:$0xff] }
  0x6a   :  { %999 = vmatprep.subr.bf16.mxu1 %v998_v29  ;;  %v586_v29 = vld [vmem:[#allocation7 + $0xa0] sm:$0xff]  ;;  %v1056_v40 = vpack.c.bf16 %v603_v39, %v602_v38  ;;  %v620_v43 = vld [vmem:[#allocation7 + $0x1b0] sm:$0xff]  ;;  %v621_v45 = vld [vmem:[#allocation7 + $0x1b8] sm:$0xff] }
  0x6b   :  { %v1022_v32 = vpack.c.bf16 %v587_v30, %v586_v29  ;;  %v572_v47 = vld [vmem:[#allocation7 + $0x30] sm:$0xff]  ;;  %v605_v52 = vld [vmem:[#allocation7 + $0x138] sm:$0xff]  ;;  %v591_v55 = vld [vmem:[#allocation7 + $0xc8] sm:$0xff] }
  0x6c   :  { %969 = vmatpush1.bf16.msra.mxu0 %v968_v35  ;;  %v571_v35 = vld [vmem:[#allocation7 + $0x28] sm:$0xff]  ;;  %v604_v51 = vld [vmem:[#allocation7 + $0x130] sm:$0xff]  ;;  %v622_v56 = vld [vmem:[#allocation7 + $0x1c0] sm:$0xff] }
  0x6d   :  { %1001 = vmatpush1.bf16.msra.mxu1 %v1000_v36  ;;  %971 = vmatprep.subr.bf16.mxu0 %v970_v37  ;;  %v1054_v36 = vpack.c.bf16 %v619_v33, %v618_v31  ;;  %v1024_v37 = vpack.c.bf16 %v571_v35, %v570_v34  ;;  %v1060_v53 = vpack.c.bf16 %v605_v52, %v604_v51  ;;  %v623_v58 = vld [vmem:[#allocation7 + $0x1c8] sm:$0xff]  ;;  %v574_v59 = vld [vmem:[#allocation7 + $0x40] sm:$0xff]  ;;  %v592_v4 = vld [vmem:[#allocation7 + $0xd0] sm:$0xff] }
  0x6e   :  { %1003 = vmatprep.subr.bf16.mxu1 %v1002_v41  ;;  %v588_v41 = vld [vmem:[#allocation7 + $0xb0] sm:$0xff]  ;;  %v606_v1 = vld [vmem:[#allocation7 + $0x140] sm:$0xff]  ;;  %v607_v2 = vld [vmem:[#allocation7 + $0x148] sm:$0xff] }
  0x6f   :  { %v1026_v44 = vpack.c.bf16 %v589_v42, %v588_v41  ;;  %v593_v5 = vld [vmem:[#allocation7 + $0xd8] sm:$0xff]  ;;  %v576_v9 = vld [vmem:[#allocation7 + $0x50] sm:$0xff]  ;;  %v579_v20 = vld [vmem:[#allocation7 + $0x68] sm:$0xff] }
  0x70   :  { %973 = vmatpush1.bf16.msra.mxu0 %v972_v48  ;;  %v573_v48 = vld [vmem:[#allocation7 + $0x38] sm:$0xff]  ;;  %v608_v13 = vld [vmem:[#allocation7 + $0x150] sm:$0xff]  ;;  %v610_v22 = vld [vmem:[#allocation7 + $0x160] sm:$0xff] }
  0x71   :  { %1005 = vmatpush1.bf16.msra.mxu1 %v1004_v49  ;;  %975 = vmatprep.subr.bf16.mxu0 %v974_v50  ;;  %v1058_v49 = vpack.c.bf16 %v621_v45, %v620_v43  ;;  %v1028_v50 = vpack.c.bf16 %v573_v48, %v572_v47  ;;  %v625_v8 = vld [vmem:[#allocation7 + $0x1d8] sm:$0xff]  ;;  %v611_v23 = vld [vmem:[#allocation7 + $0x168] sm:$0xff]  ;;  %v628_v27 = vld [vmem:[#allocation7 + $0x1f0] sm:$0xff] }
  0x72   :  { %1007 = vmatprep.subr.bf16.mxu1 %v1006_v54  ;;  %v590_v54 = vld [vmem:[#allocation7 + $0xc0] sm:$0xff]  ;;  %v577_v10 = vld [vmem:[#allocation7 + $0x58] sm:$0xff]  ;;  %v580_v30 = vld [vmem:[#allocation7 + $0x70] sm:$0xff] }
  0x73   :  { %v1030_v57 = vpack.c.bf16 %v591_v55, %v590_v54  ;;  %v1036_v12 = vpack.c.bf16 %v577_v10, %v576_v9  ;;  %v609_v14 = vld [vmem:[#allocation7 + $0x158] sm:$0xff]  ;;  %v612_v34 = vld [vmem:[#allocation7 + $0x170] sm:$0xff] }
  0x74   :  { %977 = vmatpush1.bf16.msra.mxu0 %v976_v60  ;;  %v575_v60 = vld [vmem:[#allocation7 + $0x48] sm:$0xff]  ;;  %v597_v26 = vld [vmem:[#allocation7 + $0xf8] sm:$0xff] }
  0x75   :  { %1009 = vmatpush1.bf16.msra.mxu1 %v1008_v62  ;;  %979 = vmatprep.subr.bf16.mxu0 %v978_v63  ;;  %v1062_v62 = vpack.c.bf16 %v623_v58, %v622_v56  ;;  %v1032_v63 = vpack.c.bf16 %v575_v60, %v574_v59  ;;  %v629_v29 = vld [vmem:[#allocation7 + $0x1f8] sm:$0xff] }
  0x76   :  { %1011 = vmatprep.subr.bf16.mxu1 %v1010_v3  ;;  %v1064_v3 = vpack.c.bf16 %v607_v2, %v606_v1  ;;  %v581_v31 = vld [vmem:[#allocation7 + $0x78] sm:$0xff] }
  0x77   :  { %v1044_v33 = vpack.c.bf16 %v581_v31, %v580_v30  ;;  %v613_v35 = vld [vmem:[#allocation7 + $0x178] sm:$0xff] }
  0x78   :  { %981 = vmatpush1.bf16.msra.mxu0 %v980_v6  ;;  %v624_v6 = vld [vmem:[#allocation7 + $0x1d0] sm:$0xff] }
  0x79   :  { %1013 = vmatpush1.bf16.msra.mxu1 %v1012_v7  ;;  %1015 = vmatprep.subr.bf16.mxu0 %v1014_v11  ;;  %v1034_v7 = vpack.c.bf16 %v593_v5, %v592_v4  ;;  %v1066_v11 = vpack.c.bf16 %v625_v8, %v624_v6 }
  0x7a   :  { %1047 = vmatprep.subr.bf16.mxu1 %v1046_v15  ;;  %v1068_v15 = vpack.c.bf16 %v609_v14, %v608_v13 }
  0x7b   :  { %411 = vmatmul.mubr.f32.vlgmr.msra.gmra.mrb[4].mxu0 %v1286_v46 }
  0x7c   :  { %488 = vmatmul.mubr.f32.vlgmr.msra.gmra.mrb[4].mxu1 %v1286_v46  ;;  %416 = vmatprep.mubr.f32.mxu0 %v1220_v0  ;;  %v1048_v46 = vpack.c.bf16 %v599_v18, %v598_v17  ;;  %v595_v17 = vld [vmem:[#allocation7 + $0xe8] sm:$0xff]  ;;  %v626_v18 = vld [vmem:[#allocation7 + $0x1e0] sm:$0xff] }
  0x7d   :  { %493 = vmatprep.mubr.f32.mxu1 %v1220_v0  ;;  %1017 = vmatpush3.bf16.msra.mxu0 %v1016_v16  ;;  %v584_v0 = vld [vmem:[#allocation7 + $0x90] sm:$0xff]  ;;  %v594_v16 = vld [vmem:[#allocation7 + $0xe0] sm:$0xff] }
  0x7e   :  { %1049 = vmatpush3.bf16.msra.mxu1 %v1048_v46  ;;  %v1038_v46 = vpack.c.bf16 %v595_v17, %v594_v16 }
  0x7f   :  { %417 = vmatmul.mubr.f32.gmra.mrb[6].mxu0 %v1290_v61  ;;  %1051 = vmatprep.subr.bf16.mxu1 %v1050_v24  ;;  %v1072_v24 = vpack.c.bf16 %v611_v23, %v610_v22 }
  0x80   :  { %494 = vmatmul.mubr.f32.gmra.mrb[6].mxu1 %v1290_v61  ;;  %v1018_v61 = vpack.c.bf16 %v585_v19, %v584_v0  ;;  %v627_v0 = vld [vmem:[#allocation7 + $0x1e8] sm:$0xff]  ;;  %v578_v19 = vld [vmem:[#allocation7 + $0x60] sm:$0xff] }
  0x81   :  { %v1040_v21 = vpack.c.bf16 %v579_v20, %v578_v19 }
  0x82   :  { %1019 = vmatprep.subr.bf16.mxu0 %v1018_v61  ;;  %1053 = vmatpush3.bf16.msra.mxu1 %v1052_v28  ;;  %v1070_v61 = vpack.c.bf16 %v627_v0, %v626_v18 }
  0x83   :  { %1021 = vmatpush3.bf16.msra.mxu0 %v1020_v25  ;;  %1055 = vmatprep.subr.bf16.mxu1 %v1054_v36  ;;  %v596_v25 = vld [vmem:[#allocation7 + $0xf0] sm:$0xff]  ;;  %v1076_v36 = vpack.c.bf16 %v613_v35, %v612_v34 }
  0x84   :  { %1023 = vmatprep.subr.bf16.mxu0 %v1022_v32  ;;  %v1042_v28 = vpack.c.bf16 %v597_v26, %v596_v25  ;;  %v1074_v32 = vpack.c.bf16 %v629_v29, %v628_v27 }
  0x86   :  { %1057 = vmatpush3.bf16.msra.mxu1 %v1056_v40 }
  0x87   :  { %1025 = vmatpush3.bf16.msra.mxu0 %v1024_v37  ;;  %1059 = vmatprep.subr.bf16.mxu1 %v1058_v49 }
  0x88   :  { %1027 = vmatprep.subr.bf16.mxu0 %v1026_v44 }
  0x8a   :  { %1061 = vmatpush3.bf16.msra.mxu1 %v1060_v53 }
  0x8b   :  { %1029 = vmatpush3.bf16.msra.mxu0 %v1028_v50  ;;  %1063 = vmatprep.subr.bf16.mxu1 %v1062_v62 }
  0x8c   :  { %1031 = vmatprep.subr.bf16.mxu0 %v1030_v57 }
  0x8e   :  { %1065 = vmatpush3.bf16.msra.mxu1 %v1064_v3 }
  0x8f   :  { %1033 = vmatpush3.bf16.msra.mxu0 %v1032_v63  ;;  %1067 = vmatprep.subr.bf16.mxu1 %v1066_v11 }
  0x90   :  { %1035 = vmatprep.subr.bf16.mxu0 %v1034_v7 }
  0x92   :  { %1069 = vmatpush3.bf16.msra.mxu1 %v1068_v15 }
  0x93   :  { %1037 = vmatpush3.bf16.msra.mxu0 %v1036_v12  ;;  %1071 = vmatprep.subr.bf16.mxu1 %v1070_v61 }
  0x94   :  { %1039 = vmatprep.subr.bf16.mxu0 %v1038_v46 }
  0x96   :  { %1073 = vmatpush3.bf16.msra.mxu1 %v1072_v24 }
  0x97   :  { %1041 = vmatpush3.bf16.msra.mxu0 %v1040_v21  ;;  %1075 = vmatprep.subr.bf16.mxu1 %v1074_v32 }
  0x98   :  { %1043 = vmatprep.subr.bf16.mxu0 %v1042_v28 }
  0x9a   :  { %1077 = vmatpush3.bf16.msra.mxu1 %v1076_v36 }
  0x9b   :  { %1045 = vmatpush3.bf16.msra.mxu0 %v1044_v33 }
 0x12e   :  { %v258_v37 = vpop.f32.mrb[0].mxu0 }
 0x12f   :  { %v802_v38 = vmul.f32 -1.442695, %v258_v37  ;;  %v335_v39 = vpop.f32.mrb[0].mxu1  ;;  %v260_v40 = vpop.f32.mrb[1].mxu0 }
 0x130   :  { %v804_v41 = vmul.f32 -1.442695, %v335_v39  ;;  %v803_v42 = vmul.f32 -1.442695, %v260_v40  ;;  %v337_v43 = vpop.f32.mrb[1].mxu1 }
 0x131   :  { %1087 = vpow2.f32 %v802_v38  ;;  %v805_v44 = vmul.f32 -1.442695, %v337_v43 }
 0x132   :  { %1089 = vpow2.f32 %v804_v41  ;;  %v264_v45 = vpop.f32.mrb[2].mxu0 }
 0x133   :  { %1091 = vpow2.f32 %v803_v42  ;;  %v806_v47 = vmul.f32 -1.442695, %v264_v45  ;;  %v341_v48 = vpop.f32.mrb[2].mxu1  ;;  %v266_v49 = vpop.f32.mrb[3].mxu0 }
 0x134   :  { %1093 = vpow2.f32 %v805_v44  ;;  %v808_v50 = vmul.f32 -1.442695, %v341_v48  ;;  %v807_v51 = vmul.f32 -1.442695, %v266_v49  ;;  %v343_v52 = vpop.f32.mrb[3].mxu1 }
 0x135   :  { %1095 = vpow2.f32 %v806_v47  ;;  %v809_v53 = vmul.f32 -1.442695, %v343_v52 }
 0x136   :  { %1097 = vpow2.f32 %v808_v50 }
 0x137   :  { %1099 = vpow2.f32 %v807_v51 }
 0x138   :  { %1101 = vpow2.f32 %v809_v53 }
 0x13b   :  { %v1088_v54 = vpop.eup %1087 }
 0x13c   :  { %v1090_v55 = vpop.eup %1089  ;;  %v524_v56 = vadd.f32 1.0, %v1088_v54 }
 0x13d   :  { %v1092_v57 = vpop.eup %1091  ;;  %v526_v58 = vadd.f32 1.0, %v1090_v55 }
 0x13e   :  { %v1094_v59 = vpop.eup %1093  ;;  %v525_v60 = vadd.f32 1.0, %v1092_v57  ;;  %1103 = vrcp.f32 %v524_v56 }
 0x13f   :  { %v1096_v62 = vpop.eup %1095  ;;  %v527_v63 = vadd.f32 1.0, %v1094_v59  ;;  %1105 = vrcp.f32 %v526_v58 }
 0x140   :  { %v1098_v1 = vpop.eup %1097  ;;  %v528_v2 = vadd.f32 1.0, %v1096_v62  ;;  %1107 = vrcp.f32 %v525_v60 }
 0x141   :  { %v1100_v3 = vpop.eup %1099  ;;  %v530_v4 = vadd.f32 1.0, %v1098_v1  ;;  %1109 = vrcp.f32 %v527_v63 }
 0x142   :  { %v1102_v5 = vpop.eup %1101  ;;  %v529_v6 = vadd.f32 1.0, %v1100_v3  ;;  %1111 = vrcp.f32 %v528_v2 }
 0x143   :  { %v531_v7 = vadd.f32 1.0, %v1102_v5  ;;  %1113 = vrcp.f32 %v530_v4 }
 0x144   :  { %1115 = vrcp.f32 %v529_v6 }
 0x145   :  { %1117 = vrcp.f32 %v531_v7 }
 0x148   :  { %v1104_v8 = vpop.eup %1103 }
 0x149   :  { %v1106_v9 = vpop.eup %1105  ;;  %v548_v13 = vmul.f32 %v1104_v8, %v258_v37 }
 0x14a   :  { %v1108_v10 = vpop.eup %1107  ;;  %v550_v15 = vmul.f32 %v1106_v9, %v335_v39 }
 0x14b   :  { %v1110_v11 = vpop.eup %1109  ;;  %v549_v16 = vmul.f32 %v1108_v10, %v260_v40 }
 0x14c   :  { %v1112_v12 = vpop.eup %1111  ;;  %v551_v46 = vmul.f32 %v1110_v11, %v337_v43 }
 0x14d   :  { %v1114_v14 = vpop.eup %1113  ;;  %v552_v24 = vmul.f32 %v1112_v12, %v264_v45 }
 0x14e   :  { %v412_v17 = vpop.f32.mrb[4].mxu0  ;;  %v1116_v18 = vpop.eup %1115  ;;  %v554_v26 = vmul.f32 %v1114_v14, %v341_v48 }
 0x14f   :  { %v556_v0 = vmul.f32 %v548_v13, %v412_v17  ;;  %v489_v19 = vpop.f32.mrb[4].mxu1  ;;  %v414_v20 = vpop.f32.mrb[5].mxu0  ;;  %v553_v27 = vmul.f32 %v1116_v18, %v266_v49 }
 0x150   :  { %v1118_v61 = vpop.eup %1117  ;;  %v558_v21 = vmul.f32 %v550_v15, %v489_v19  ;;  %v557_v22 = vmul.f32 %v549_v16, %v414_v20  ;;  %v491_v23 = vpop.f32.mrb[5].mxu1 }
 0x151   :  { %v559_v25 = vmul.f32 %v551_v46, %v491_v23  ;;  %v555_v29 = vmul.f32 %v1118_v61, %v343_v52 }
 0x152   :  { %v418_v28 = vpop.f32.mrb[6].mxu0  ;;  %694 = vmatprep.mubr.f32.mxu0 %v557_v22 }
 0x153   :  { %v560_v30 = vmul.f32 %v552_v24, %v418_v28  ;;  %v495_v31 = vpop.f32.mrb[6].mxu1  ;;  %769 = vmatprep.mubr.f32.mxu1 %v559_v25  ;;  %v420_v32 = vpop.f32.mrb[7].mxu0  ;;  %695 = vmatmul.mubr.f32.vlgmr.msra.gmra.mrb[8].mxu0 %v556_v0 }
 0x154   :  { %v562_v33 = vmul.f32 %v554_v26, %v495_v31  ;;  %v561_v34 = vmul.f32 %v553_v27, %v420_v32  ;;  %v497_v35 = vpop.f32.mrb[7].mxu1  ;;  %770 = vmatmul.mubr.f32.vlgmr.msra.gmra.mrb[8].mxu1 %v558_v21 }
 0x155   :  { %v563_v36 = vmul.f32 %v555_v29, %v497_v35 }
 0x156   :  { %699 = vmatprep.mubr.f32.mxu0 %v561_v34 }
 0x157   :  { %774 = vmatprep.mubr.f32.mxu1 %v563_v36  ;;  %700 = vmatmul.mubr.f32.gmra.mrb[10].mxu0 %v560_v30 }
 0x158   :  { %775 = vmatmul.mubr.f32.gmra.mrb[10].mxu1 %v562_v33 }
 0x226   :  { %v842_v37 = vpop.f32.mrb[8].mxu0 }
 0x227   :  { %v880_v38 = vpop.f32.mrb[8].mxu1  ;;  %v843_v39 = vpop.f32.mrb[9].mxu0 }
 0x228   :  { %v844_v40 = vadd.f32 %v843_v39, %v842_v37  ;;  %v881_v41 = vpop.f32.mrb[9].mxu1 }
 0x229   :  { %v882_v42 = vadd.f32 %v881_v41, %v880_v38 }
 0x22a   :  { %v845_v43 = vpop.f32.mrb[10].mxu0 }
 0x22b   :  { %v772_v44 = vadd.f32 %v882_v42, %v844_v40  ;;  %v883_v45 = vpop.f32.mrb[10].mxu1  ;;  %v846_v47 = vpop.f32.mrb[11].mxu0 }
 0x22c   :  { %v847_v48 = vadd.f32 %v846_v47, %v845_v43  ;;  %v884_v49 = vpop.f32.mrb[11].mxu1 }
 0x22d   :  { %v885_v50 = vadd.f32 %v884_v49, %v883_v45  ;;  %782 = vst [vmem:[#allocation8] sm:$0xff] %v772_v44 }
 0x22f   :  { %v777_v51 = vadd.f32 %v885_v50, %v847_v48 }
 0x231   :  { %783 = vst [vmem:[#allocation8 + $0x8] sm:$0xff] %v777_v51 }
 0x232   :  { %1196 = shalt.err (!%p1193_p0)
}
 0x233   :  { %s1197_s27 = scalar_lea.hbm %s1322_s3, 256 }
 0x234   :  { %p1198_p1 = scmp.ne.s32.totalorder %s1322_s3, %s1197_s27  ;;  %p1201_p2 = scmp.lt.u32.totalorder %s1197_s27, %s1322_s3 }
 0x236   :  { %p1203_p3 = pnand %p1201_p2, %p1198_p1 }
 0x238   :  { %1206 = shalt.err (!%p1203_p3)
}
 0x239   :  { %795 = dma.vmem_to_hbm [thread:$0]  %s790_s23, 256, %s1322_s3, [#allocation4], %s1217_s1, %s1217_s1, %s1218_s9  }
 0x23a   :  { %1211 = dma.done.wait [#allocation4], 256  }
 0x23b   :  { %1212 = vsyncadd [#allocation4], 4294967040 }
 0x23c   :  { %799 = vsyncpa [#allocation3], 1 }
 0x23d   :  { %800 = vsyncpa [#allocation6], 1 }
 0x23e   :  { %801 = vsyncpa [#allocation4], 1 }

</bundles_post_ra>
